<compile_context>
chip_gen: v6e
topology: v6e:2x2x1
jax: 0.10.0
libtpu: 0.0.40
codegen_flags: <defaults>
</compile_context>

<pallas_src>
import functools
import math
import numpy as np
import jax
import jax.numpy as jnp
from jax import lax
from jax.experimental import pallas as pl
from jax.experimental.pallas import tpu as pltpu


# ------------------------------- kernel -------------------------------------

def _rtb_kernel(x_ref, cond_ref,
                w1f_ref, b1f_ref, g1_ref, be1_ref,
                w2f_ref, b2_ref, g2_ref, be2_ref,
                grp_ref, segr_ref, segb_ref, mask_ref,
                o_ref, *, K, lanes, cout, bb):
    pad = K // 2
    f32 = jnp.float32

    def mish(v):
        # x * tanh(softplus(x)) == x * (e^2 + 2e) / (e^2 + 2e + 2), e = exp(x)
        # -> 2 EUP ops (exp + reciprocal) instead of exp + log1p + tanh.
        e = jnp.exp(jnp.minimum(v, 30.0))            # ratio is 1.0 (f32) beyond this
        num = e * (e + 2.0)
        return v * num * pl.reciprocal(num + 2.0)

    def seg_bcast(v):
        # [C, bb] -> per-lane value.  bb == 1: plain VPU lane-broadcast (keeps the
        # tiny dependent-MXU chain short); bb > 1: constant selector matmul.
        if bb == 1:
            return v
        return jnp.dot(v, segb_ref[...], preferred_element_type=f32)

    def stack_taps(h):
        # h: [C, lanes].  Tap k needs h at lane offset (k - pad); implemented as a
        # circular XLU roll (free slot, no VMEM round-trip) + constant boundary mask
        # that zeroes any lane whose tap would cross a batch-segment / valid-length
        # edge (this also kills the circular wrap-around lanes).
        pieces = []
        for k in range(K):
            if k == pad:
                pieces.append(h)                       # center tap: aligned, no mask
            else:
                p = pltpu.roll(h, (pad - k) % lanes, 1)
                pieces.append(p * mask_ref[k:k + 1, :])
        return jnp.concatenate(pieces, axis=0)         # [K*C, lanes]

    def group_norm(h, gamma, beta, eps=1e-5):
        # Per-(batch-segment, group) stats via constant selector matmuls.  segr
        # zeroes padded lanes; grp is pre-scaled by 1/(channels_per_group * L) so
        # the reductions are direct means.  Two-pass (centered) variance.
        grp, segr = grp_ref[...], segr_ref[...]
        mean = jnp.dot(grp, jnp.dot(h, segr, preferred_element_type=f32),
                       preferred_element_type=f32)                    # [Cout, bb]
        cent = h - seg_bcast(mean)
        var = jnp.dot(grp, jnp.dot(cent * cent, segr, preferred_element_type=f32),
                      preferred_element_type=f32)                     # [Cout, bb]
        scale = gamma * lax.rsqrt(var + eps)                          # [Cout, bb]
        return cent * seg_bcast(scale) + beta

    # ---- blocks[0] Conv1d(K) and residual 1x1 conv fused into one MXU matmul ----
    fused = jnp.dot(w1f_ref[...], stack_taps(x_ref[0]),
                    preferred_element_type=f32) + b1f_ref[...]        # [2*Cout, lanes]
    h1 = fused[:cout]                                                 # conv1 pre-act
    res = fused[cout:]                                                # residual path

    out1 = mish(group_norm(h1, g1_ref[...], be1_ref[...])) + seg_bcast(cond_ref[0])

    # ---- blocks[1]: taps straight from the live value via rolls (no scratch) ----
    h2 = jnp.dot(w2f_ref[...], stack_taps(out1),
                 preferred_element_type=f32) + b2_ref[...]            # [Cout, lanes]

    o_ref[0] = mish(group_norm(h2, g2_ref[...], be2_ref[...])) + res


# ------------------------------ JAX wrapper ----------------------------------

def _softplus(v):
    return jnp.maximum(v, 0.0) + jnp.log1p(jnp.exp(-jnp.abs(v)))


def _pick_layout(B, L, batch_block=None, max_lanes=1024):
    """Pick (bb, L_p): bb batch elems folded per step, L padded to L_p so the folded
    lane width bb*L_p is a multiple of 128 (dense stores).  Prefers >= 2 grid steps
    (both v7x TensorCores busy), then minimal padding, then more batch folding."""
    def lane_pad(bb):
        q = 128 // math.gcd(bb, 128)          # L_p must be a multiple of q
        return -(-L // q) * q
    if batch_block is not None:
        assert B % batch_block == 0
        return batch_block, lane_pad(batch_block)
    best = None
    for bb in range(1, B + 1):
        if B % bb:
            continue
        L_p = lane_pad(bb)
        lanes = bb * L_p
        nbb = B // bb
        score = (lanes > max_lanes,           # cap lane width (vreg pressure)
                 nbb < 2,                     # keep grid >= 2 steps when possible
                 lanes * nbb,                 # minimal padded DMA traffic
                 -bb)                         # then fold more batch per step
        if best is None or score < best[0]:
            best = (score, bb, L_p)
    return best[1], best[2]


def residual_temporal_block(x, t, params, *, kernel_size=3, n_groups=8,
                            batch_block=None):
    f32 = jnp.float32
    B, Cin, L = x.shape
    K = kernel_size
    pad = K // 2
    Cout = params["conv1_w"].shape[0]
    assert Cout % n_groups == 0
    assert Cout % 8 == 0, "Cout must be a multiple of 8 (sublane-aligned slices)"
    cg = Cout // n_groups

    bb, L_p = _pick_layout(B, L, batch_block)
    nbb = B // bb
    lanes = bb * L_p                                  # multiple of 128 by construction
    Cin_p = -(-Cin // 8) * 8                          # pad input channels to a sublane group

    # ---- activation layout: [B, Cin, L] -> [nbb, Cin_p, bb*L_p] (lane-dense) ----
    x_l = jnp.pad(x.astype(f32), ((0, 0), (0, 0), (0, L_p - L)))
    x_l = x_l.reshape(nbb, bb, Cin, L_p).transpose(0, 2, 1, 3).reshape(nbb, Cin, lanes)
    x_l = jnp.pad(x_l, ((0, 0), (0, Cin_p - Cin), (0, 0)))

    # ---- time_mlp (Mish -> Linear) in plain JAX; kernel only broadcasts it ----
    tf = t.astype(f32)
    tm = tf * jnp.tanh(_softplus(tf))
    cond = tm @ params["lin_w"].astype(f32).T + params["lin_b"].astype(f32)   # [B, Cout]
    cond_l = cond.reshape(nbb, bb, Cout).transpose(0, 2, 1)                   # [nbb, Cout, bb]

    # ---- fused conv weights (tap-major columns); residual rides as extra rows ----
    w1 = jnp.pad(params["conv1_w"].astype(f32), ((0, 0), (0, Cin_p - Cin), (0, 0)))
    w1f = jnp.transpose(w1, (0, 2, 1)).reshape(Cout, K * Cin_p)
    res_w = jnp.pad(params["res_w"].astype(f32), ((0, 0), (0, Cin_p - Cin)))
    resf = jnp.zeros((Cout, K, Cin_p), f32).at[:, pad, :].set(res_w)
    resf = resf.reshape(Cout, K * Cin_p)
    W1f = jnp.concatenate([w1f, resf], axis=0)                                # [2Cout, K*Cin_p]
    b1f = jnp.concatenate([params["conv1_b"], params["res_b"]]).astype(f32)[:, None]

    W2f = jnp.transpose(params["conv2_w"].astype(f32), (0, 2, 1)).reshape(Cout, K * Cout)
    b2 = params["conv2_b"].astype(f32)[:, None]

    # ---- hoisted GroupNorm / segment-validity / conv-boundary constants ----
    gid = jnp.arange(Cout) // cg
    grp = (gid[:, None] == gid[None, :]).astype(f32) / float(cg * L)          # [Cout, Cout]
    seg = jnp.arange(lanes) // L_p
    posl = jnp.arange(lanes) % L_p
    valid = posl < L                                                          # padded lanes excluded
    segr = ((seg[:, None] == jnp.arange(bb)[None, :]) & valid[:, None]).astype(f32)  # [lanes, bb]
    segb = (seg[:, None] == jnp.arange(bb)[None, :]).astype(f32).T            # [bb, lanes]
    masks = jnp.stack([((posl + (k - pad) >= 0) & (posl + (k - pad) < L)).astype(f32)
                       for k in range(K)], axis=0)                            # [K, lanes]

    col = lambda v: v.astype(f32)[:, None]
    g1c, be1c = col(params["gn1_g"]), col(params["gn1_b"])
    g2c, be2c = col(params["gn2_g"]), col(params["gn2_b"])

    def full_spec(shape):
        n = len(shape)
        return pl.BlockSpec(shape, lambda b, _n=n: (0,) * _n)

    kern = functools.partial(_rtb_kernel, K=K, lanes=lanes, cout=Cout, bb=bb)

    operands = (x_l, cond_l, W1f, b1f, g1c, be1c, W2f, b2, g2c, be2c,
                grp, segr, segb, masks)

    # Advisory cost estimate so XLA schedules the wrapper-side ops around the call.
    flops = nbb * (2 * lanes * (2 * Cout * K * Cin_p + Cout * K * Cout)
                   + 8 * Cout * lanes)
    cost = pl.CostEstimate(
        flops=int(flops),
        transcendentals=int(nbb * 4 * Cout * lanes),
        bytes_accessed=int(4 * (sum(int(np.prod(o.shape)) for o in operands)
                                + nbb * Cout * lanes)))

    out = pl.pallas_call(
        kern,
        out_shape=jax.ShapeDtypeStruct((nbb, Cout, lanes), f32),
        grid_spec=pltpu.PrefetchScalarGridSpec(
            num_scalar_prefetch=0,
            grid=(nbb,),
            in_specs=[
                pl.BlockSpec((1, Cin_p, lanes), lambda b: (b, 0, 0)),   # x slab (no halo)
                pl.BlockSpec((1, Cout, bb), lambda b: (b, 0, 0)),       # cond
                full_spec((2 * Cout, K * Cin_p)),                       # W1 + res
                full_spec((2 * Cout, 1)),                               # b1 + res_b
                full_spec((Cout, 1)),                                   # gn1 gamma
                full_spec((Cout, 1)),                                   # gn1 beta
                full_spec((Cout, K * Cout)),                            # W2
                full_spec((Cout, 1)),                                   # b2
                full_spec((Cout, 1)),                                   # gn2 gamma
                full_spec((Cout, 1)),                                   # gn2 beta
                full_spec((Cout, Cout)),                                # group mat
                full_spec((lanes, bb)),                                 # seg reduce (valid lanes)
                full_spec((bb, lanes)),                                 # seg bcast (bb>1 path)
                full_spec((K, lanes)),                                  # tap boundary masks
            ],
            out_specs=pl.BlockSpec((1, Cout, lanes), lambda b: (b, 0, 0)),
        ),
        compiler_params=pltpu.CompilerParams(
            dimension_semantics=("parallel",),
            # v7x-safe default; v5e/v6e (128 MiB VMEM) could raise this with bigger tiles.
            vmem_limit_bytes=32 * 1024 * 1024,
        ),
        cost_estimate=cost,
    )(*operands)

    # undo the lane-folded layout: [nbb, Cout, bb*L_p] -> [B, Cout, L]
    out = out.reshape(nbb, Cout, bb, L_p).transpose(0, 2, 1, 3).reshape(B, Cout, L_p)
    return out[:, :, :L]


# ---------------------------- pure-JAX reference -----------------------------

def _reference(x, t, params, kernel_size=3, n_groups=8, eps=1e-5):
    K = kernel_size
    pad = K // 2

    def conv1d(h, w, b):
        hp = jnp.pad(h, ((0, 0), (0, 0), (pad, pad)))
        L = h.shape[2]
        out = b[None, :, None]
        for k in range(K):
            out = out + jnp.einsum('oi,bil->bol', w[:, :, k], hp[:, :, k:k + L])
        return out

    def gnorm(h, gamma, beta):
        B, C, L = h.shape
        cg = C // n_groups
        hg = h.reshape(B, n_groups, cg * L)
        mean = hg.mean(-1, keepdims=True)
        var = hg.var(-1, keepdims=True)
        hn = ((hg - mean) / jnp.sqrt(var + eps)).reshape(B, C, L)
        return hn * gamma[None, :, None] + beta[None, :, None]

    mish = lambda v: v * jnp.tanh(_softplus(v))

    cond = (mish(t) @ params["lin_w"].T + params["lin_b"])[:, :, None]
    h = mish(gnorm(conv1d(x, params["conv1_w"], params["conv1_b"]),
                   params["gn1_g"], params["gn1_b"])) + cond
    h = mish(gnorm(conv1d(h, params["conv2_w"], params["conv2_b"]),
                   params["gn2_g"], params["gn2_b"]))
    res = jnp.einsum('oi,bil->bol', params["res_w"], x) + params["res_b"][None, :, None]
    return h + res


# ---------------------------------- main -------------------------------------

if __name__ == "__main__":
    B, Cin, Cout, L, E, K = 2, 4, 16, 16, 32, 3

    key = jax.random.PRNGKey(0)
    ks = jax.random.split(key, 16)
    f32 = jnp.float32
    params = {
        "conv1_w": 0.2 * jax.random.normal(ks[0], (Cout, Cin, K), f32),
        "conv1_b": 0.1 * jax.random.normal(ks[1], (Cout,), f32),
        "gn1_g": 1.0 + 0.1 * jax.random.normal(ks[2], (Cout,), f32),
        "gn1_b": 0.1 * jax.random.normal(ks[3], (Cout,), f32),
        "lin_w": 0.2 * jax.random.normal(ks[4], (Cout, E), f32),
        "lin_b": 0.1 * jax.random.normal(ks[5], (Cout,), f32),
        "conv2_w": 0.2 * jax.random.normal(ks[6], (Cout, Cout, K), f32),
        "conv2_b": 0.1 * jax.random.normal(ks[7], (Cout,), f32),
        "gn2_g": 1.0 + 0.1 * jax.random.normal(ks[8], (Cout,), f32),
        "gn2_b": 0.1 * jax.random.normal(ks[9], (Cout,), f32),
        "res_w": 0.2 * jax.random.normal(ks[10], (Cout, Cin), f32),  # 1x1 conv weight
        "res_b": 0.1 * jax.random.normal(ks[11], (Cout,), f32),
    }

    x = jax.random.normal(ks[12], (B, Cin, L), f32)
    t = jax.random.normal(ks[13], (B, E), f32)

    out = residual_temporal_block(x, t, params, kernel_size=K, n_groups=8)
    out = jax.block_until_ready(out)

    ref = _reference(x, t, params, kernel_size=K, n_groups=8)
    np.testing.assert_allclose(np.asarray(out), np.asarray(ref), rtol=1e-4, atol=1e-4)

    print("KERNEL_OK")
</pallas_src>

<mosaic_0001>
module attributes {stable_mosaic.version = 11 : i64} {
  func.func @_rtb_kernel(%arg0: i32, %arg1: memref<1x8x128xf32, #tpu.memory_space<vmem>>, %arg2: memref<1x16x1xf32, #tpu.memory_space<vmem>>, %arg3: memref<32x24xf32, #tpu.memory_space<vmem>>, %arg4: memref<32x1xf32, #tpu.memory_space<vmem>>, %arg5: memref<16x1xf32, #tpu.memory_space<vmem>>, %arg6: memref<16x1xf32, #tpu.memory_space<vmem>>, %arg7: memref<16x48xf32, #tpu.memory_space<vmem>>, %arg8: memref<16x1xf32, #tpu.memory_space<vmem>>, %arg9: memref<16x1xf32, #tpu.memory_space<vmem>>, %arg10: memref<16x1xf32, #tpu.memory_space<vmem>>, %arg11: memref<16x16xf32, #tpu.memory_space<vmem>>, %arg12: memref<128x1xf32, #tpu.memory_space<vmem>>, %arg13: memref<1x128xf32, #tpu.memory_space<vmem>>, %arg14: memref<3x128xf32, #tpu.memory_space<vmem>>, %arg15: memref<1x16x128xf32, #tpu.memory_space<vmem>>) attributes {dimension_semantics = [#tpu.dimension_semantics<parallel>], iteration_bounds = array<i64: 2>, scalar_prefetch = 0 : i64, scratch_operands = 0 : i64, tpu.core_type = #tpu.core_type<tc>, window_params = [{transform_indices = @transform_0, window_bounds = array<i64: 1, 8, 128>}, {transform_indices = @transform_1, window_bounds = array<i64: 1, 16, 1>}, {pipeline_mode = #tpu.pipeline_mode<synchronous>, transform_indices = @transform_2, window_bounds = array<i64: 32, 24>}, {pipeline_mode = #tpu.pipeline_mode<synchronous>, transform_indices = @transform_3, window_bounds = array<i64: 32, 1>}, {pipeline_mode = #tpu.pipeline_mode<synchronous>, transform_indices = @transform_4, window_bounds = array<i64: 16, 1>}, {pipeline_mode = #tpu.pipeline_mode<synchronous>, transform_indices = @transform_5, window_bounds = array<i64: 16, 1>}, {pipeline_mode = #tpu.pipeline_mode<synchronous>, transform_indices = @transform_6, window_bounds = array<i64: 16, 48>}, {pipeline_mode = #tpu.pipeline_mode<synchronous>, transform_indices = @transform_7, window_bounds = array<i64: 16, 1>}, {pipeline_mode = #tpu.pipeline_mode<synchronous>, transform_indices = @transform_8, window_bounds = array<i64: 16, 1>}, {pipeline_mode = #tpu.pipeline_mode<synchronous>, transform_indices = @transform_9, window_bounds = array<i64: 16, 1>}, {pipeline_mode = #tpu.pipeline_mode<synchronous>, transform_indices = @transform_10, window_bounds = array<i64: 16, 16>}, {pipeline_mode = #tpu.pipeline_mode<synchronous>, transform_indices = @transform_11, window_bounds = array<i64: 128, 1>}, {pipeline_mode = #tpu.pipeline_mode<synchronous>, transform_indices = @transform_12, window_bounds = array<i64: 1, 128>}, {pipeline_mode = #tpu.pipeline_mode<synchronous>, transform_indices = @transform_13, window_bounds = array<i64: 3, 128>}, {transform_indices = @transform_14, window_bounds = array<i64: 1, 16, 128>}]} {
    %c0 = arith.constant 0 : index
    %c0_0 = arith.constant 0 : index
    %0 = vector.load %arg3[%c0, %c0_0] : memref<32x24xf32, #tpu.memory_space<vmem>>, vector<32x24xf32>
    %c0_1 = arith.constant 0 : index
    %c0_2 = arith.constant 0 : index
    %c0_3 = arith.constant 0 : index
    %1 = vector.load %arg1[%c0_1, %c0_2, %c0_3] : memref<1x8x128xf32, #tpu.memory_space<vmem>>, vector<1x8x128xf32>
    %2 = vector.shape_cast %1 : vector<1x8x128xf32> to vector<8x128xf32>
    %c1_i32 = arith.constant 1 : i32
    %3 = tpu.dynamic_rotate %2 by %c1_i32 dim 1 : vector<8x128xf32>, i32 -> vector<8x128xf32>
    %c0_4 = arith.constant 0 : index
    %c0_5 = arith.constant 0 : index
    %4 = vector.load %arg14[%c0_4, %c0_5] : memref<3x128xf32, #tpu.memory_space<vmem>>, vector<1x128xf32>
    %5 = vector.broadcast %4 : vector<1x128xf32> to vector<8x128xf32>
    %6 = arith.mulf %3, %5 : vector<8x128xf32>
    %c127_i32 = arith.constant 127 : i32
    %7 = tpu.dynamic_rotate %2 by %c127_i32 dim 1 : vector<8x128xf32>, i32 -> vector<8x128xf32>
    %c2 = arith.constant 2 : index
    %c0_6 = arith.constant 0 : index
    %8 = vector.load %arg14[%c2, %c0_6] : memref<3x128xf32, #tpu.memory_space<vmem>>, vector<1x128xf32>
    %9 = vector.broadcast %8 : vector<1x128xf32> to vector<8x128xf32>
    %10 = arith.mulf %7, %9 : vector<8x128xf32>
    %11 = tpu.concatenate %6, %2, %10 in 0 : vector<8x128xf32>, vector<8x128xf32>, vector<8x128xf32> -> vector<24x128xf32>
    %cst = arith.constant dense<0.000000e+00> : vector<32x128xf32>
    %12 = tpu.matmul %0, %11, %cst {dimension_numbers = #tpu.dot_dimension_numbers<[1], [0], [0], [1], [0, 0, 1, 1], [], []>} : vector<32x24xf32>, vector<24x128xf32>, vector<32x128xf32> -> vector<32x128xf32>
    %c0_7 = arith.constant 0 : index
    %c0_8 = arith.constant 0 : index
    %13 = vector.load %arg4[%c0_7, %c0_8] : memref<32x1xf32, #tpu.memory_space<vmem>>, vector<32x1xf32>
    %14 = vector.broadcast %13 : vector<32x1xf32> to vector<32x128xf32>
    %15 = arith.addf %12, %14 : vector<32x128xf32>
    %16 = vector.extract_strided_slice %15 {offsets = [0, 0], sizes = [16, 128], strides = [1, 1]} : vector<32x128xf32> to vector<16x128xf32>
    %17 = vector.extract_strided_slice %15 {offsets = [16, 0], sizes = [16, 128], strides = [1, 1]} : vector<32x128xf32> to vector<16x128xf32>
    %c0_9 = arith.constant 0 : index
    %c0_10 = arith.constant 0 : index
    %18 = vector.load %arg5[%c0_9, %c0_10] : memref<16x1xf32, #tpu.memory_space<vmem>>, vector<16x1xf32>
    %c0_11 = arith.constant 0 : index
    %c0_12 = arith.constant 0 : index
    %19 = vector.load %arg6[%c0_11, %c0_12] : memref<16x1xf32, #tpu.memory_space<vmem>>, vector<16x1xf32>
    %c0_13 = arith.constant 0 : index
    %c0_14 = arith.constant 0 : index
    %20 = vector.load %arg11[%c0_13, %c0_14] : memref<16x16xf32, #tpu.memory_space<vmem>>, vector<16x16xf32>
    %c0_15 = arith.constant 0 : index
    %c0_16 = arith.constant 0 : index
    %21 = vector.load %arg12[%c0_15, %c0_16] : memref<128x1xf32, #tpu.memory_space<vmem>>, vector<128x1xf32>
    %cst_17 = arith.constant dense<0.000000e+00> : vector<16x1xf32>
    %22 = tpu.matmul %16, %21, %cst_17 {dimension_numbers = #tpu.dot_dimension_numbers<[1], [0], [0], [1], [0, 0, 1, 1], [], []>} : vector<16x128xf32>, vector<128x1xf32>, vector<16x1xf32> -> vector<16x1xf32>
    %cst_18 = arith.constant dense<0.000000e+00> : vector<16x1xf32>
    %23 = tpu.matmul %20, %22, %cst_18 {dimension_numbers = #tpu.dot_dimension_numbers<[1], [0], [0], [1], [0, 0, 1, 1], [], []>} : vector<16x16xf32>, vector<16x1xf32>, vector<16x1xf32> -> vector<16x1xf32>
    %24 = vector.broadcast %23 : vector<16x1xf32> to vector<16x128xf32>
    %25 = arith.subf %16, %24 : vector<16x128xf32>
    %26 = arith.mulf %25, %25 : vector<16x128xf32>
    %cst_19 = arith.constant dense<0.000000e+00> : vector<16x1xf32>
    %27 = tpu.matmul %26, %21, %cst_19 {dimension_numbers = #tpu.dot_dimension_numbers<[1], [0], [0], [1], [0, 0, 1, 1], [], []>} : vector<16x128xf32>, vector<128x1xf32>, vector<16x1xf32> -> vector<16x1xf32>
    %cst_20 = arith.constant dense<0.000000e+00> : vector<16x1xf32>
    %28 = tpu.matmul %20, %27, %cst_20 {dimension_numbers = #tpu.dot_dimension_numbers<[1], [0], [0], [1], [0, 0, 1, 1], [], []>} : vector<16x16xf32>, vector<16x1xf32>, vector<16x1xf32> -> vector<16x1xf32>
    %cst_21 = arith.constant 9.99999974E-6 : f32
    %29 = vector.broadcast %cst_21 : f32 to vector<16x1xf32>
    %30 = arith.addf %28, %29 : vector<16x1xf32>
    %31 = math.rsqrt %30 : vector<16x1xf32>
    %32 = arith.mulf %18, %31 : vector<16x1xf32>
    %33 = vector.broadcast %32 : vector<16x1xf32> to vector<16x128xf32>
    %34 = arith.mulf %25, %33 : vector<16x128xf32>
    %35 = vector.broadcast %19 : vector<16x1xf32> to vector<16x128xf32>
    %36 = arith.addf %34, %35 : vector<16x128xf32>
    %cst_22 = arith.constant 3.000000e+01 : f32
    %37 = vector.broadcast %cst_22 : f32 to vector<16x128xf32>
    %38 = arith.minimumf %36, %37 : vector<16x128xf32>
    %39 = math.exp %38 : vector<16x128xf32>
    %cst_23 = arith.constant 2.000000e+00 : f32
    %40 = vector.broadcast %cst_23 : f32 to vector<16x128xf32>
    %41 = arith.addf %39, %40 : vector<16x128xf32>
    %42 = arith.mulf %39, %41 : vector<16x128xf32>
    %43 = arith.mulf %36, %42 : vector<16x128xf32>
    %cst_24 = arith.constant 2.000000e+00 : f32
    %44 = vector.broadcast %cst_24 : f32 to vector<16x128xf32>
    %45 = arith.addf %42, %44 : vector<16x128xf32>
    %46 = tpu.reciprocal %45 : vector<16x128xf32> -> vector<16x128xf32>
    %47 = arith.mulf %43, %46 : vector<16x128xf32>
    %c0_25 = arith.constant 0 : index
    %c0_26 = arith.constant 0 : index
    %c0_27 = arith.constant 0 : index
    %48 = vector.load %arg2[%c0_25, %c0_26, %c0_27] : memref<1x16x1xf32, #tpu.memory_space<vmem>>, vector<1x16x1xf32>
    %49 = vector.shape_cast %48 : vector<1x16x1xf32> to vector<16x1xf32>
    %50 = vector.broadcast %49 : vector<16x1xf32> to vector<16x128xf32>
    %51 = arith.addf %47, %50 : vector<16x128xf32>
    %c0_28 = arith.constant 0 : index
    %c0_29 = arith.constant 0 : index
    %52 = vector.load %arg7[%c0_28, %c0_29] : memref<16x48xf32, #tpu.memory_space<vmem>>, vector<16x48xf32>
    %c1_i32_30 = arith.constant 1 : i32
    %53 = tpu.dynamic_rotate %51 by %c1_i32_30 dim 1 : vector<16x128xf32>, i32 -> vector<16x128xf32>
    %c0_31 = arith.constant 0 : index
    %c0_32 = arith.constant 0 : index
    %54 = vector.load %arg14[%c0_31, %c0_32] : memref<3x128xf32, #tpu.memory_space<vmem>>, vector<1x128xf32>
    %55 = vector.broadcast %54 : vector<1x128xf32> to vector<16x128xf32>
    %56 = arith.mulf %53, %55 : vector<16x128xf32>
    %c127_i32_33 = arith.constant 127 : i32
    %57 = tpu.dynamic_rotate %51 by %c127_i32_33 dim 1 : vector<16x128xf32>, i32 -> vector<16x128xf32>
    %c2_34 = arith.constant 2 : index
    %c0_35 = arith.constant 0 : index
    %58 = vector.load %arg14[%c2_34, %c0_35] : memref<3x128xf32, #tpu.memory_space<vmem>>, vector<1x128xf32>
    %59 = vector.broadcast %58 : vector<1x128xf32> to vector<16x128xf32>
    %60 = arith.mulf %57, %59 : vector<16x128xf32>
    %61 = tpu.concatenate %56, %51, %60 in 0 : vector<16x128xf32>, vector<16x128xf32>, vector<16x128xf32> -> vector<48x128xf32>
    %cst_36 = arith.constant dense<0.000000e+00> : vector<16x128xf32>
    %62 = tpu.matmul %52, %61, %cst_36 {dimension_numbers = #tpu.dot_dimension_numbers<[1], [0], [0], [1], [0, 0, 1, 1], [], []>} : vector<16x48xf32>, vector<48x128xf32>, vector<16x128xf32> -> vector<16x128xf32>
    %c0_37 = arith.constant 0 : index
    %c0_38 = arith.constant 0 : index
    %63 = vector.load %arg8[%c0_37, %c0_38] : memref<16x1xf32, #tpu.memory_space<vmem>>, vector<16x1xf32>
    %64 = vector.broadcast %63 : vector<16x1xf32> to vector<16x128xf32>
    %65 = arith.addf %62, %64 : vector<16x128xf32>
    %c0_39 = arith.constant 0 : index
    %c0_40 = arith.constant 0 : index
    %66 = vector.load %arg9[%c0_39, %c0_40] : memref<16x1xf32, #tpu.memory_space<vmem>>, vector<16x1xf32>
    %c0_41 = arith.constant 0 : index
    %c0_42 = arith.constant 0 : index
    %67 = vector.load %arg10[%c0_41, %c0_42] : memref<16x1xf32, #tpu.memory_space<vmem>>, vector<16x1xf32>
    %c0_43 = arith.constant 0 : index
    %c0_44 = arith.constant 0 : index
    %68 = vector.load %arg11[%c0_43, %c0_44] : memref<16x16xf32, #tpu.memory_space<vmem>>, vector<16x16xf32>
    %c0_45 = arith.constant 0 : index
    %c0_46 = arith.constant 0 : index
    %69 = vector.load %arg12[%c0_45, %c0_46] : memref<128x1xf32, #tpu.memory_space<vmem>>, vector<128x1xf32>
    %cst_47 = arith.constant dense<0.000000e+00> : vector<16x1xf32>
    %70 = tpu.matmul %65, %69, %cst_47 {dimension_numbers = #tpu.dot_dimension_numbers<[1], [0], [0], [1], [0, 0, 1, 1], [], []>} : vector<16x128xf32>, vector<128x1xf32>, vector<16x1xf32> -> vector<16x1xf32>
    %cst_48 = arith.constant dense<0.000000e+00> : vector<16x1xf32>
    %71 = tpu.matmul %68, %70, %cst_48 {dimension_numbers = #tpu.dot_dimension_numbers<[1], [0], [0], [1], [0, 0, 1, 1], [], []>} : vector<16x16xf32>, vector<16x1xf32>, vector<16x1xf32> -> vector<16x1xf32>
    %72 = vector.broadcast %71 : vector<16x1xf32> to vector<16x128xf32>
    %73 = arith.subf %65, %72 : vector<16x128xf32>
    %74 = arith.mulf %73, %73 : vector<16x128xf32>
    %cst_49 = arith.constant dense<0.000000e+00> : vector<16x1xf32>
    %75 = tpu.matmul %74, %69, %cst_49 {dimension_numbers = #tpu.dot_dimension_numbers<[1], [0], [0], [1], [0, 0, 1, 1], [], []>} : vector<16x128xf32>, vector<128x1xf32>, vector<16x1xf32> -> vector<16x1xf32>
    %cst_50 = arith.constant dense<0.000000e+00> : vector<16x1xf32>
    %76 = tpu.matmul %68, %75, %cst_50 {dimension_numbers = #tpu.dot_dimension_numbers<[1], [0], [0], [1], [0, 0, 1, 1], [], []>} : vector<16x16xf32>, vector<16x1xf32>, vector<16x1xf32> -> vector<16x1xf32>
    %cst_51 = arith.constant 9.99999974E-6 : f32
    %77 = vector.broadcast %cst_51 : f32 to vector<16x1xf32>
    %78 = arith.addf %76, %77 : vector<16x1xf32>
    %79 = math.rsqrt %78 : vector<16x1xf32>
    %80 = arith.mulf %66, %79 : vector<16x1xf32>
    %81 = vector.broadcast %80 : vector<16x1xf32> to vector<16x128xf32>
    %82 = arith.mulf %73, %81 : vector<16x128xf32>
    %83 = vector.broadcast %67 : vector<16x1xf32> to vector<16x128xf32>
    %84 = arith.addf %82, %83 : vector<16x128xf32>
    %cst_52 = arith.constant 3.000000e+01 : f32
    %85 = vector.broadcast %cst_52 : f32 to vector<16x128xf32>
    %86 = arith.minimumf %84, %85 : vector<16x128xf32>
    %87 = math.exp %86 : vector<16x128xf32>
    %cst_53 = arith.constant 2.000000e+00 : f32
    %88 = vector.broadcast %cst_53 : f32 to vector<16x128xf32>
    %89 = arith.addf %87, %88 : vector<16x128xf32>
    %90 = arith.mulf %87, %89 : vector<16x128xf32>
    %91 = arith.mulf %84, %90 : vector<16x128xf32>
    %cst_54 = arith.constant 2.000000e+00 : f32
    %92 = vector.broadcast %cst_54 : f32 to vector<16x128xf32>
    %93 = arith.addf %90, %92 : vector<16x128xf32>
    %94 = tpu.reciprocal %93 : vector<16x128xf32> -> vector<16x128xf32>
    %95 = arith.mulf %91, %94 : vector<16x128xf32>
    %96 = arith.addf %95, %17 : vector<16x128xf32>
    %c0_55 = arith.constant 0 : index
    %c0_56 = arith.constant 0 : index
    %c0_57 = arith.constant 0 : index
    %97 = vector.load %arg15[%c0_55, %c0_56, %c0_57] : memref<1x16x128xf32, #tpu.memory_space<vmem>>, vector<1x16x128xf32>
    %98 = vector.shape_cast %97 : vector<1x16x128xf32> to vector<16x128xf32>
    %99 = vector.shape_cast %96 : vector<16x128xf32> to vector<1x16x128xf32>
    tpu.vector_store %arg15[%c0_55, %c0_56, %c0_57], %99 {strides = array<i32>} : memref<1x16x128xf32, #tpu.memory_space<vmem>>, vector<1x16x128xf32>,
    return
  }
  func.func @transform_0(%arg0: i32) -> (i32, i32, i32) {
    %c0_i32 = arith.constant 0 : i32
    %c0_i32_0 = arith.constant 0 : i32
    %c0_i32_1 = arith.constant 0 : i32
    return %arg0, %c0_i32, %c0_i32_0 : i32, i32, i32
  }
  func.func @transform_1(%arg0: i32) -> (i32, i32, i32) {
    %c0_i32 = arith.constant 0 : i32
    %c0_i32_0 = arith.constant 0 : i32
    %c0_i32_1 = arith.constant 0 : i32
    return %arg0, %c0_i32, %c0_i32_0 : i32, i32, i32
  }
  func.func @transform_2(%arg0: i32) -> (i32, i32) {
    %c0_i32 = arith.constant 0 : i32
    %c0_i32_0 = arith.constant 0 : i32
    %c0_i32_1 = arith.constant 0 : i32
    return %c0_i32, %c0_i32_0 : i32, i32
  }
  func.func @transform_3(%arg0: i32) -> (i32, i32) {
    %c0_i32 = arith.constant 0 : i32
    %c0_i32_0 = arith.constant 0 : i32
    %c0_i32_1 = arith.constant 0 : i32
    return %c0_i32, %c0_i32_0 : i32, i32
  }
  func.func @transform_4(%arg0: i32) -> (i32, i32) {
    %c0_i32 = arith.constant 0 : i32
    %c0_i32_0 = arith.constant 0 : i32
    %c0_i32_1 = arith.constant 0 : i32
    return %c0_i32, %c0_i32_0 : i32, i32
  }
  func.func @transform_5(%arg0: i32) -> (i32, i32) {
    %c0_i32 = arith.constant 0 : i32
    %c0_i32_0 = arith.constant 0 : i32
    %c0_i32_1 = arith.constant 0 : i32
    return %c0_i32, %c0_i32_0 : i32, i32
  }
  func.func @transform_6(%arg0: i32) -> (i32, i32) {
    %c0_i32 = arith.constant 0 : i32
    %c0_i32_0 = arith.constant 0 : i32
    %c0_i32_1 = arith.constant 0 : i32
    return %c0_i32, %c0_i32_0 : i32, i32
  }
  func.func @transform_7(%arg0: i32) -> (i32, i32) {
    %c0_i32 = arith.constant 0 : i32
    %c0_i32_0 = arith.constant 0 : i32
    %c0_i32_1 = arith.constant 0 : i32
    return %c0_i32, %c0_i32_0 : i32, i32
  }
  func.func @transform_8(%arg0: i32) -> (i32, i32) {
    %c0_i32 = arith.constant 0 : i32
    %c0_i32_0 = arith.constant 0 : i32
    %c0_i32_1 = arith.constant 0 : i32
    return %c0_i32, %c0_i32_0 : i32, i32
  }
  func.func @transform_9(%arg0: i32) -> (i32, i32) {
    %c0_i32 = arith.constant 0 : i32
    %c0_i32_0 = arith.constant 0 : i32
    %c0_i32_1 = arith.constant 0 : i32
    return %c0_i32, %c0_i32_0 : i32, i32
  }
  func.func @transform_10(%arg0: i32) -> (i32, i32) {
    %c0_i32 = arith.constant 0 : i32
    %c0_i32_0 = arith.constant 0 : i32
    %c0_i32_1 = arith.constant 0 : i32
    return %c0_i32, %c0_i32_0 : i32, i32
  }
  func.func @transform_11(%arg0: i32) -> (i32, i32) {
    %c0_i32 = arith.constant 0 : i32
    %c0_i32_0 = arith.constant 0 : i32
    %c0_i32_1 = arith.constant 0 : i32
    return %c0_i32, %c0_i32_0 : i32, i32
  }
  func.func @transform_12(%arg0: i32) -> (i32, i32) {
    %c0_i32 = arith.constant 0 : i32
    %c0_i32_0 = arith.constant 0 : i32
    %c0_i32_1 = arith.constant 0 : i32
    return %c0_i32, %c0_i32_0 : i32, i32
  }
  func.func @transform_13(%arg0: i32) -> (i32, i32) {
    %c0_i32 = arith.constant 0 : i32
    %c0_i32_0 = arith.constant 0 : i32
    %c0_i32_1 = arith.constant 0 : i32
    return %c0_i32, %c0_i32_0 : i32, i32
  }
  func.func @transform_14(%arg0: i32) -> (i32, i32, i32) {
    %c0_i32 = arith.constant 0 : i32
    %c0_i32_0 = arith.constant 0 : i32
    %c0_i32_1 = arith.constant 0 : i32
    return %arg0, %c0_i32, %c0_i32_0 : i32, i32, i32
  }
}

</mosaic_0001>

<bundles_post_ra>
// kernel: tpu_custom_call.1
= control target key start
LH: loop header
LB: loop body
LE: loop exit
PB: predicated region body
PF: predicated region fallthrough
CT: control target
= control target key end

     0   :  { %19 = vsyncpa [#allocation3], 0  ;;  %s2582_s0 = inlined_call_operand.vmem [shape: f32[2,8,128], index: 0, kind: input, shape index: {}]   ;;  %s2583_s1 = inlined_call_operand.vmem [shape: f32[2,16,1], index: 1, kind: input, shape index: {}]   ;;  %s2584_s2 = inlined_call_operand.vmem [shape: f32[32,24], index: 2, kind: input, shape index: {}]   ;;  %s2585_s3 = inlined_call_operand.vmem [shape: f32[32,1], index: 3, kind: input, shape index: {}]   ;;  %s2586_s4 = inlined_call_operand.vmem [shape: f32[16,1], index: 4, kind: input, shape index: {}]   ;;  %s2587_s5 = inlined_call_operand.vmem [shape: f32[16,1], index: 5, kind: input, shape index: {}]   ;;  %s2588_s6 = inlined_call_operand.vmem [shape: f32[16,48], index: 6, kind: input, shape index: {}]   ;;  %s2589_s7 = inlined_call_operand.vmem [shape: f32[16,1], index: 7, kind: input, shape index: {}]   ;;  %s2590_s8 = inlined_call_operand.vmem [shape: f32[16,1], index: 8, kind: input, shape index: {}]   ;;  %s2591_s9 = inlined_call_operand.vmem [shape: f32[16,1], index: 9, kind: input, shape index: {}]   ;;  %s2592_s10 = inlined_call_operand.vmem [shape: f32[16,16], index: 10, kind: input, shape index: {}]   ;;  %s2593_s11 = inlined_call_operand.vmem [shape: f32[128,1], index: 11, kind: input, shape index: {}]   ;;  %s2594_s12 = inlined_call_operand.vmem [shape: f32[1,128], index: 12, kind: input, shape index: {}]   ;;  %s2595_s13 = inlined_call_operand.vmem [shape: f32[3,128], index: 13, kind: input, shape index: {}]   ;;  %s2596_s14 = inlined_call_operand.hbm [shape: f32[2,16,128], index: 14, kind: output, shape index: {}]  }
   0x1   :  { %21 = vsyncpa [#allocation3 + $0x1], 0  ;;  %s2135_s29 = smov 0   ;;  %s2137_s30 = smov 0  }
   0x2   :  { %s2139_s15 = smov 0   ;;  %s2141_s16 = smov 0  }
   0x3 LB: > { %2604 = sst [smem:[#allocation5_spill]] %s2048_s15  ;;  %s2156_s12 = sadd.s32 4294967295, %s2052_s16   ;;  %s2052_s16 = sphi %s2141_s16, %s2611_s16   ;;  %s2048_s15 = sphi %s2139_s15, %s2613_s15   ;;  %s2044_s30 = sphi %s2137_s30, %s2615_s30   ;;  %s2040_s29 = sphi %s2135_s29, %s2614_s29  }
   0x4   : > { %s1593_s17 = sadd.s32 4294967294, %s2052_s16   ;;  %s2160_s18 = sadd.s32 1, %s2052_s16  }
   0x5   : > { %2605 = sst [smem:[#allocation6_spill]] %s2160_s18  ;;  %s338_s19 = sadd.s32 1, %s2048_s15 }
   0x6   : > { %s335_s20 = ssub.s32 %s2052_s16, %s2160_s18  ;;  %p348_p0 = scmp.ne.s32.totalorder %s2048_s15, %s2044_s30 }
   0x7   : > { %p336_p1 = scmp.eq.s32.totalorder %s335_s20, 0  ;;  %p349_p2 = scmp.eq.s32.totalorder %s2156_s12, 1 }
   0x8   : > { %p354_p3 = scmp.ne.s32.totalorder %s2044_s30, %s2040_s29  ;;  %p355_p4 = scmp.eq.s32.totalorder %s1593_s17, 1 }
   0x9   : > { %s2171_s21 = scalar_select %p336_p1, %s2048_s15, %s338_s19  }
   0xa   : > { %p2173_p5 = por %p349_p2, %p348_p0  ;;  %p2177_p6 = por %p355_p4, %p354_p3 }
   0xb   : > { %2606 = sst [smem:[#allocation7_spill]] %s2171_s21  ;;  %p1596_p7 = scmp.ge.s32.totalorder %s2052_s16, 1 }
   0xc   : > { %p424_p8 = scmp.lt.s32.totalorder %s2052_s16, 3 }
   0xe   : > { %p425_p9 = pnand %p1596_p7, %p424_p8 }
   0xf   : > { %p474_p10 = scmp.lt.s32.totalorder (!%p425_p9), %s2156_s12, 1  ;;  %s2602_s27 = smov (!%p425_p9), 127  }
  0x10   : > { %428 = sbr.rel (%p425_p9) target bundleno = 2892 (0xb4c), region = 76  ;;  %s2600_s28 = smov (!%p425_p9), 1  }
  0x11   : > { %s2610_s15 = smov (!%p425_p9), 1   ;;  %s1623_s18 = sshll.u32 (!%p425_p9), %s2156_s12, 8 }
  0x12   : > { %s2540_s17 = scalar_lea.hbm (!%p425_p9), %s2596_s14, %s1623_s18 }
  0x15   : > { %v483_v0 = vld [vmem:[%s2584_s2] sm:$0xff]  ;;  %vm528_vm0 = vcmask 195584   ;;  %s2188_s26 = scalar_select %p474_p10, %s2156_s12, 1  ;;  %v2197_v2 = vld [vmem:[%s2593_s11 + $0x78] sm:$0xff]  ;;  %v2054_v3 = vmov 0   ;;  %v2203_v4 = vld [vmem:[%s2593_s11 + $0x70] sm:$0xff] }
  0x16   : > { %1733 = vmatprep.mubr.msk.f32.mxu0 %vm528_vm0, %v483_v0  ;;  %v504_v1 = vld [vmem:[%s2585_s3] sm:$0xff]  ;;  %1966 = vset.pattern.permute.xlu1 %v2054_v3  ;;  %v2210_v5 = vld [vmem:[%s2593_s11 + $0x68] sm:$0xff]  ;;  %v2231_v9 = vld [vmem:[%s2593_s11 + $0x58] sm:$0xff]  ;;  %vm723_vm1 = vcmask 130048   ;;  %vm1055_vm2 = vcmask 392192  }
  0x17   : > { %1739 = vmatprep.subr.mxu1 %v2197_v2  ;;  %s1598_s25 = sshll.u32 %s2188_s26, 3  ;;  %510 = vperm.xlu1 %1966, %v504_v1   ;;  %v505_v6 = vld [vmem:[%s2585_s3 + $0x8] sm:$0xff]  ;;  %v2223_v8 = vld [vmem:[%s2593_s11 + $0x60] sm:$0xff]  ;;  %v2238_v10 = vld [vmem:[%s2593_s11 + $0x50] sm:$0xff] }
  0x18   : > { %1740 = vmatpush3.msra.mxu1 %v2197_v2  ;;  %s477_s21 = scalar_lea.vmem %s2582_s0, %s1598_s25  ;;  %1967 = vset.pattern.permute.xlu0 %v2054_v3  ;;  %v2246_v11 = vld [vmem:[%s2593_s11 + $0x48] sm:$0xff]  ;;  %v2253_v12 = vld [vmem:[%s2593_s11 + $0x40] sm:$0xff]  ;;  %v2260_v13 = vld [vmem:[%s2593_s11 + $0x38] sm:$0xff] }
  0x19   : > { %1741 = vmatprep.subr.mxu1 %v2203_v4  ;;  %v487_v7 = vld [vmem:[%s477_s21] sm:$0xff]  ;;  %v2267_v14 = vld [vmem:[%s2593_s11 + $0x30] sm:$0xff]  ;;  %v2274_v15 = vld [vmem:[%s2593_s11 + $0x28] sm:$0xff]  ;;  %s1622_s21 = sshll.u32 %s2188_s26, 4  ;;  %s471_s26 = sand.u32 1, %s2044_s30  }
  0x1a   : > { %1742 = vmatpush3.msra.mxu1 %v2203_v4  ;;  %496 = vrot.lane.b32.xlu0 %v487_v7, %s2602_s27  ;;  %v2281_v16 = vld [vmem:[%s2593_s11 + $0x20] sm:$0xff]  ;;  %v2288_v17 = vld [vmem:[%s2593_s11 + $0x18] sm:$0xff]  ;;  %v484_v24 = vld [vmem:[%s2584_s2 + $0x8] sm:$0xff]  ;;  %s482_s20 = scalar_lea.vmem %s2583_s1, %s1622_s21  ;;  %s1597_s27 = sshll.u32 %s471_s26, 4 }
  0x1b   : > { %1743 = vmatprep.subr.mxu1 %v2210_v5  ;;  %515 = vperm.xlu1 %1966, %v505_v6   ;;  %v2297_v18 = vld [vmem:[%s2595_s13 + $0x2] ss:$0 sm:$0xff]  ;;  %v2303_v21 = vld [vmem:[%s2595_s13] ss:$0 sm:$0xff]  ;;  %v2313_v25 = vld [vmem:[%s2593_s11 + $0x10] sm:$0xff]  ;;  %s2542_s19 = scalar_lea.sflag [#allocation3], %s471_s26 }
  0x1c   : > { %1744 = vmatpush3.msra.mxu1 %v2210_v5  ;;  %v2320_v26 = vld [vmem:[%s2593_s11 + $0x8] sm:$0xff]  ;;  %v2327_v27 = vld [vmem:[%s2593_s11] sm:$0xff]  ;;  %v485_v28 = vld [vmem:[%s2584_s2 + $0x10] sm:$0xff] }
  0x1d   : > { %1745 = vmatprep.subr.mxu1 %v2223_v8  ;;  %v486_v35 = vld [vmem:[%s2584_s2 + $0x18] sm:$0xff]  ;;  %v2342_v36 = vld [vmem:[%s2592_s10] sm:$0xff]  ;;  %v2351_v39 = vld [vmem:[%s2592_s10 + $0x8] sm:$0xff] }
  0x1e   : > { %1746 = vmatpush3.msra.mxu1 %v2223_v8  ;;  %488 = vrot.lane.b32.xlu0 %v487_v7, %s2600_s28  ;;  %v627_v56 = vld [vmem:[%s2586_s4 + $0x8] sm:$0xff]  ;;  %v626_v58 = vld [vmem:[%s2586_s4] sm:$0xff]  ;;  %s2609_s28 = smov 127  }
  0x1f   : > { %1747 = vmatprep.subr.mxu1 %v2231_v9  ;;  %v629_v62 = vld [vmem:[%s2587_s5 + $0x8] sm:$0xff]  ;;  %v628_v63 = vld [vmem:[%s2587_s5] sm:$0xff] }
  0x20   : > { %1748 = vmatpush3.msra.mxu1 %v2231_v9  ;;  %v1016_v0 = vld [vmem:[%s482_s20 + $0x8] sm:$0xff]  ;;  %v1015_v1 = vld [vmem:[%s482_s20] sm:$0xff]  ;;  %s2057_s20 = smov [#allocation2]  }
  0x21   : > { %1749 = vmatprep.subr.mxu1 %v2238_v10  ;;  %s1996_s24 = sshll.u32 %s2057_s20, 4  ;;  %s1997_s24 = int_to_ptr.vmem [resolvable:$false] %s1996_s24 }
  0x22   : > { %1750 = vmatpush3.msra.mxu1 %v2238_v10 }
  0x23   : > { %1751 = vmatprep.subr.mxu1 %v2246_v11 }
  0x24   : > { %1752 = vmatpush3.msra.mxu1 %v2246_v11 }
  0x25   : > { %1753 = vmatprep.subr.mxu1 %v2253_v12 }
  0x26   : > { %1754 = vmatpush3.msra.mxu1 %v2253_v12 }
  0x27   : > { %1755 = vmatprep.subr.mxu1 %v2260_v13 }
  0x28   : > { %1756 = vmatpush3.msra.mxu1 %v2260_v13 }
  0x29   : > { %1757 = vmatprep.subr.mxu1 %v2267_v14 }
  0x2a   : > { %1758 = vmatpush3.msra.mxu1 %v2267_v14 }
  0x2b   : > { %1759 = vmatprep.subr.mxu1 %v2274_v15 }
  0x2c   : > { %1760 = vmatpush3.msra.mxu1 %v2274_v15 }
  0x2d   : > { %1761 = vmatprep.subr.mxu1 %v2281_v16 }
  0x2e   : > { %1762 = vmatpush3.msra.mxu1 %v2281_v16 }
  0x2f   : > { %1763 = vmatprep.subr.mxu1 %v2288_v17 }
  0x30   : > { %1764 = vmatpush3.msra.mxu1 %v2288_v17 }
  0x31   : > { %1765 = vmatprep.subr.mxu1 %v2313_v25 }
  0x32   : > { %1766 = vmatpush3.msra.mxu1 %v2313_v25 }
  0x33   : > { %1767 = vmatprep.subr.mxu1 %v2320_v26 }
  0x34   : > { %1768 = vmatpush3.msra.mxu1 %v2320_v26 }
  0x35   : > { %1769 = vmatprep.subr.mxu1 %v2327_v27 }
  0x36   : > { %1770 = vmatpush3.msra.mxu1 %v2327_v27 }
  0x8c   : > { %v497_v19 = vpop.permute.xlu0 %496 }
  0x8d   : > { %v503_v20 = vmul.f32 %v2297_v18, %v497_v19 }
  0x8f   : > { %1727 = vmatprep.subr.mxu0 %v503_v20 }
  0x90   : > { %1728 = vmatpush3.msra.mxu0 %v503_v20  ;;  %v489_v22 = vpop.permute.xlu0 %488 }
  0x91   : > { %v495_v23 = vmul.f32 %v2303_v21, %v489_v22  ;;  %1729 = vmatprep.subr.mxu0 %v487_v7 }
  0x92   : > { %1730 = vmatpush3.msra.mxu0 %v487_v7  ;;  %v511_v29 = vpop.permute.xlu1 %510 }
  0x93   : > { %1731 = vmatprep.subr.mxu0 %v495_v23 }
  0x94   : > { %1732 = vmatpush3.msra.mxu0 %v495_v23 }
  0x95   : > { %1734 = vmatmul.mubr.msk.f32.vlgmr.msra.gmra.mxu0 %vm528_vm0, %v484_v24 }
  0x96   : > { %1736 = vmatprep.mubr.msk.f32.mxu0 %vm528_vm0, %v485_v28  ;;  %v516_v31 = vpop.permute.xlu1 %515 }
  0x99   : > { %1737 = vmatmul.mubr.msk.f32.gmra.mxu0 %vm528_vm0, %v486_v35 }
  0x9a   : > { %1778 = vmatprep.mubr.msk.f32.mxu0 %vm723_vm1, %v2342_v36 }
 0x155   : > { %v1735_v30 = vpop.f32.mrf.mxu0 }
 0x156   : > { %v613_v34 = vadd.f32 %v1735_v30, %v516_v31 }
 0x157   : > { %v607_v32 = vpop.f32.mrf.mxu0 }
 0x158   : > { %v608_v33 = vadd.f32 %v607_v32, %v511_v29 }
 0x159   : > { %v2388_v40 = vpop.f32.mrf.mxu0 }
 0x15a   : > { %1771 = vmatprep.mubr.f32.mxu1 %v608_v33 }
 0x15b   : > { %1772 = vmatmul.mubr.f32.vlgmr.msra.gmra.mxu1 %v613_v34  ;;  %v2390_v41 = vpop.f32.mrf.mxu0 }
 0x15c   : > { %1820 = vmatprep.mubr.msk.f32.mxu1 %vm723_vm1, %v2342_v36 }
 0x21b   : > { %v1773_v37 = vpop.f32.mrf.mxu1 }
 0x21c   : > { %1774 = vmatprep.subr.mxu0 %v1773_v37 }
 0x21d   : > { %v714_v38 = vpop.f32.mrf.mxu1  ;;  %1775 = vmatpush3.msra.mxu0 %v1773_v37 }
 0x21e   : > { %1776 = vmatprep.subr.mxu0 %v714_v38 }
 0x21f   : > { %1777 = vmatpush3.msra.mxu0 %v714_v38 }
 0x220   : > { %1779 = vmatmul.mubr.msk.f32.vlgmr.msra.gmra.mxu0 %vm723_vm1, %v2351_v39  ;;  %1781 = vmatprep.subr.mxu0 %v2197_v2 }
 0x221   : > { %1782 = vmatpush3.msra.mxu0 %v2197_v2 }
 0x222   : > { %1783 = vmatprep.subr.mxu0 %v2203_v4 }
 0x223   : > { %1784 = vmatpush3.msra.mxu0 %v2203_v4 }
 0x224   : > { %1785 = vmatprep.subr.mxu0 %v2210_v5 }
 0x225   : > { %1786 = vmatpush3.msra.mxu0 %v2210_v5 }
 0x226   : > { %1787 = vmatprep.subr.mxu0 %v2223_v8 }
 0x227   : > { %1788 = vmatpush3.msra.mxu0 %v2223_v8 }
 0x228   : > { %1789 = vmatprep.subr.mxu0 %v2231_v9 }
 0x229   : > { %1790 = vmatpush3.msra.mxu0 %v2231_v9 }
 0x22a   : > { %1791 = vmatprep.subr.mxu0 %v2238_v10 }
 0x22b   : > { %1792 = vmatpush3.msra.mxu0 %v2238_v10 }
 0x22c   : > { %1793 = vmatprep.subr.mxu0 %v2246_v11 }
 0x22d   : > { %1794 = vmatpush3.msra.mxu0 %v2246_v11 }
 0x22e   : > { %1795 = vmatprep.subr.mxu0 %v2253_v12 }
 0x22f   : > { %1796 = vmatpush3.msra.mxu0 %v2253_v12 }
 0x230   : > { %1797 = vmatprep.subr.mxu0 %v2260_v13 }
 0x231   : > { %1798 = vmatpush3.msra.mxu0 %v2260_v13 }
 0x232   : > { %1799 = vmatprep.subr.mxu0 %v2267_v14 }
 0x233   : > { %1800 = vmatpush3.msra.mxu0 %v2267_v14 }
 0x234   : > { %1801 = vmatprep.subr.mxu0 %v2274_v15 }
 0x235   : > { %1802 = vmatpush3.msra.mxu0 %v2274_v15 }
 0x236   : > { %1803 = vmatprep.subr.mxu0 %v2281_v16 }
 0x237   : > { %1804 = vmatpush3.msra.mxu0 %v2281_v16 }
 0x238   : > { %1805 = vmatprep.subr.mxu0 %v2288_v17 }
 0x239   : > { %1806 = vmatpush3.msra.mxu0 %v2288_v17 }
 0x23a   : > { %1807 = vmatprep.subr.mxu0 %v2313_v25 }
 0x23b   : > { %1808 = vmatpush3.msra.mxu0 %v2313_v25 }
 0x23c   : > { %1809 = vmatprep.subr.mxu0 %v2320_v26 }
 0x23d   : > { %1810 = vmatpush3.msra.mxu0 %v2320_v26 }
 0x23e   : > { %1811 = vmatprep.subr.mxu0 %v2327_v27 }
 0x23f   : > { %1812 = vmatpush3.msra.mxu0 %v2327_v27 }
 0x240   : > { %1838 = vmatprep.subr.mxu0 %v2197_v2 }
 0x2e0   : > { %v1780_v42 = vpop.f32.mrf.mxu0 }
 0x2e1   : > { %812 = vperm.xlu1 %1966, %v1780_v42  }
 0x2e2   : > { %v796_v43 = vpop.f32.mrf.mxu0 }
 0x2e3   : > { %807 = vperm.xlu0 %1967, %v796_v43  }
 0x35c   : > { %v813_v44 = vpop.permute.xlu1 %812 }
 0x35d   : > { %v2392_v45 = vsub.f32 %v613_v34, %v813_v44 }
 0x35e   : > { %v808_v46 = vpop.permute.xlu0 %807 }
 0x35f   : > { %v2394_v47 = vsub.f32 %v608_v33, %v808_v46  ;;  %v818_v49 = vmul.f32 %v2392_v45, %v2392_v45 }
 0x361   : > { %v817_v48 = vmul.f32 %v2394_v47, %v2394_v47 }
 0x363   : > { %1813 = vmatprep.mubr.f32.mxu0 %v817_v48 }
 0x364   : > { %1814 = vmatmul.mubr.f32.vlgmr.msra.gmra.mxu0 %v818_v49 }
 0x365   : > { %1839 = vmatpush3.msra.mxu0 %v2197_v2 }
 0x366   : > { %1840 = vmatprep.subr.mxu0 %v2203_v4 }
 0x367   : > { %1841 = vmatpush3.msra.mxu0 %v2203_v4 }
 0x368   : > { %1842 = vmatprep.subr.mxu0 %v2210_v5 }
 0x369   : > { %1843 = vmatpush3.msra.mxu0 %v2210_v5 }
 0x36a   : > { %1844 = vmatprep.subr.mxu0 %v2223_v8 }
 0x36b   : > { %1845 = vmatpush3.msra.mxu0 %v2223_v8 }
 0x36c   : > { %1846 = vmatprep.subr.mxu0 %v2231_v9 }
 0x36d   : > { %1847 = vmatpush3.msra.mxu0 %v2231_v9 }
 0x36e   : > { %1848 = vmatprep.subr.mxu0 %v2238_v10 }
 0x36f   : > { %1849 = vmatpush3.msra.mxu0 %v2238_v10 }
 0x370   : > { %1850 = vmatprep.subr.mxu0 %v2246_v11 }
 0x371   : > { %1851 = vmatpush3.msra.mxu0 %v2246_v11 }
 0x372   : > { %1852 = vmatprep.subr.mxu0 %v2253_v12 }
 0x373   : > { %1853 = vmatpush3.msra.mxu0 %v2253_v12 }
 0x374   : > { %1854 = vmatprep.subr.mxu0 %v2260_v13 }
 0x375   : > { %1855 = vmatpush3.msra.mxu0 %v2260_v13 }
 0x376   : > { %1856 = vmatprep.subr.mxu0 %v2267_v14 }
 0x377   : > { %1857 = vmatpush3.msra.mxu0 %v2267_v14 }
 0x378   : > { %1858 = vmatprep.subr.mxu0 %v2274_v15 }
 0x379   : > { %1859 = vmatpush3.msra.mxu0 %v2274_v15 }
 0x37a   : > { %1860 = vmatprep.subr.mxu0 %v2281_v16 }
 0x37b   : > { %1861 = vmatpush3.msra.mxu0 %v2281_v16 }
 0x37c   : > { %1862 = vmatprep.subr.mxu0 %v2288_v17 }
 0x37d   : > { %1863 = vmatpush3.msra.mxu0 %v2288_v17 }
 0x37e   : > { %1864 = vmatprep.subr.mxu0 %v2313_v25 }
 0x37f   : > { %1865 = vmatpush3.msra.mxu0 %v2313_v25 }
 0x380   : > { %1866 = vmatprep.subr.mxu0 %v2320_v26 }
 0x381   : > { %1867 = vmatpush3.msra.mxu0 %v2320_v26 }
 0x382   : > { %1868 = vmatprep.subr.mxu0 %v2327_v27 }
 0x383   : > { %1869 = vmatpush3.msra.mxu0 %v2327_v27 }
 0x424   : > { %v1815_v50 = vpop.f32.mrf.mxu0 }
 0x425   : > { %1816 = vmatprep.subr.mxu1 %v1815_v50 }
 0x426   : > { %v885_v51 = vpop.f32.mrf.mxu0  ;;  %1817 = vmatpush3.msra.mxu1 %v1815_v50 }
 0x427   : > { %1818 = vmatprep.subr.mxu1 %v885_v51 }
 0x428   : > { %1819 = vmatpush3.msra.mxu1 %v885_v51 }
 0x429   : > { %1821 = vmatmul.mubr.msk.f32.vlgmr.msra.gmra.mxu1 %vm723_vm1, %v2351_v39 }
 0x4e9   : > { %v1822_v52 = vpop.f32.mrf.mxu1 }
 0x4ea   : > { %v966_v53 = vadd.f32 1e-05, %v1822_v52 }
 0x4eb   : > { %v960_v54 = vpop.f32.mrf.mxu1 }
 0x4ec   : > { %1968 = vrsqrt.f32 %v966_v53  ;;  %v961_v55 = vadd.f32 1e-05, %v960_v54  ;;  %v1029_v53 = vld [vmem:[%s2588_s6] sm:$0xff] }
 0x4ed   : > { %1835 = vmatprep.mubr.msk.f32.mxu1 %vm1055_vm2, %v1029_v53 }
 0x4ee   : > { %1970 = vrsqrt.f32 %v961_v55  ;;  %v1043_v55 = vld [vmem:[%s2589_s7] sm:$0xff] }
 0x4f9   : > { %v1969_v57 = vpop.eup %1968 }
 0x4fa   : > { %v972_v59 = vmul.f32 %v1969_v57, %v627_v56  ;;  %v1044_v56 = vld [vmem:[%s2589_s7 + $0x8] sm:$0xff] }
 0x4fb   : > { %v1971_v60 = vpop.eup %1970 }
 0x4fc   : > { %980 = vperm.xlu1 %1966, %v972_v59   ;;  %v971_v61 = vmul.f32 %v1971_v60, %v626_v58 }
 0x4fe   : > { %975 = vperm.xlu0 %1967, %v971_v61  }
 0x500   : > { %992 = vperm.xlu1 %1966, %v629_v62  }
 0x502   : > { %987 = vperm.xlu0 %1967, %v628_v63  }
 0x504   : > { %1024 = vperm.xlu1 %1966, %v1016_v0  }
 0x506   : > { %1019 = vperm.xlu0 %1967, %v1015_v1  }
 0x577   : > { %v981_v3 = vpop.permute.xlu1 %980 }
 0x578   : > { %v984_v7 = vmul.f32 %v981_v3, %v2392_v45 }
 0x579   : > { %v976_v6 = vpop.permute.xlu0 %975 }
 0x57a   : > { %v983_v20 = vmul.f32 %v976_v6, %v2394_v47 }
 0x57b   : > { %v993_v19 = vpop.permute.xlu1 %992 }
 0x57c   : > { %v996_v22 = vadd.f32 %v993_v19, %v984_v7 }
 0x57d   : > { %v988_v23 = vpop.permute.xlu0 %987 }
 0x57e   : > { %v998_v24 = vmin.f32 %v996_v22, 30.0  ;;  %v995_v28 = vadd.f32 %v988_v23, %v983_v20 }
 0x57f   : > { %v1025_v49 = vpop.permute.xlu1 %1024 }
 0x580   : > { %v1001_v29 = vmul.f32 1.442695, %v998_v24  ;;  %v997_v30 = vmin.f32 %v995_v28, 30.0 }
 0x581   : > { %v1020_v52 = vpop.permute.xlu0 %1019 }
 0x582   : > { %1972 = vpow2.f32 %v1001_v29  ;;  %v999_v31 = vmul.f32 1.442695, %v997_v30  ;;  %v1139_v29 = vld [vmem:[%s2591_s9] sm:$0xff]  ;;  %v507_v30 = vld [vmem:[%s2585_s3 + $0x18] sm:$0xff] }
 0x584   : > { %1974 = vpow2.f32 %v999_v31  ;;  %v506_v31 = vld [vmem:[%s2585_s3 + $0x10] sm:$0xff] }
 0x58f   : > { %v1973_v32 = vpop.eup %1972 }
 0x590   : > { %v1004_v33 = vadd.f32 2.0, %v1973_v32 }
 0x591   : > { %v1975_v34 = vpop.eup %1974 }
 0x592   : > { %v1006_v35 = vmul.f32 %v1973_v32, %v1004_v33  ;;  %v1003_v37 = vadd.f32 2.0, %v1975_v34 }
 0x594   : > { %v1010_v38 = vadd.f32 2.0, %v1006_v35  ;;  %v1005_v42 = vmul.f32 %v1975_v34, %v1003_v37  ;;  %v1008_v44 = vmul.f32 %v1006_v35, %v996_v22 }
 0x596   : > { %1976 = vrcp.f32 %v1010_v38  ;;  %v1009_v43 = vadd.f32 2.0, %v1005_v42  ;;  %v1007_v46 = vmul.f32 %v1005_v42, %v995_v28 }
 0x598   : > { %1978 = vrcp.f32 %v1009_v43 }
 0x5a3   : > { %v1977_v45 = vpop.eup %1976 }
 0x5a4   : > { %v1014_v47 = vmul.f32 %v1977_v45, %v1008_v44 }
 0x5a5   : > { %v1979_v48 = vpop.eup %1978 }
 0x5a6   : > { %v1028_v50 = vadd.f32 %v1025_v49, %v1014_v47  ;;  %v1013_v51 = vmul.f32 %v1979_v48, %v1007_v46 }
 0x5a8   : > { %v1027_v54 = vadd.f32 %v1020_v52, %v1013_v51  ;;  %1039 = vrot.lane.b32.xlu1 %v1028_v50, %s2609_s28 }
 0x5aa   : > { %1037 = vrot.lane.b32.xlu0 %v1027_v54, %s2609_s28  ;;  %s473_s28 = scalar_lea.vmem [#allocation2], %s1597_s27  ;;  %s1998_s27 = scalar_lea.vmem %s1997_s24, 512 }
 0x5ac   : > { %1033 = vrot.lane.b32.xlu1 %v1028_v50, %s2610_s15 }
 0x5ae   : > { %1031 = vrot.lane.b32.xlu0 %v1027_v54, %s2610_s15  ;;  %s1519_s15 = sshll.u32 %s473_s28, 4  ;;  %s2535_s15 = int_to_ptr.vmem [resolvable:$true] %s1519_s15 }
 0x5af   : > { %s1992_s12 = scalar_lea.vmem %s2535_s15, 256  ;;  %p1999_p0 = scmp.lt.s32.totalorder %s2535_s15, %s1997_s24 }
 0x5b0   : > { %1047 = vperm.xlu1 %1966, %v1043_v55   ;;  %p1993_p11 = scmp.ne.s32.totalorder %s2535_s15, %s1992_s12  ;;  %p2000_p1 = scmp.lt.s32.totalorder %s1998_s27, %s1992_s12 }
 0x5b2   : > { %1052 = vperm.xlu0 %1967, %v1044_v56   ;;  %p1994_p12 = pnand %p1993_p11, %p2173_p5  ;;  %p2001_p2 = por %p2000_p1, %p1999_p0 }
 0x5b4   : > { %p1995_p13 = pneg %p1994_p12 }
 0x5b6   : > { %p2002_p3 = pnand %p2001_p2, %p1995_p13 }
 0x61a   : > { %v1040_v57 = vpop.permute.xlu1 %1039 }
 0x61b   : > { %v1042_v58 = vmul.f32 %v2297_v18, %v1040_v57 }
 0x61c   : > { %v1038_v59 = vpop.permute.xlu0 %1037 }
 0x61d   : > { %v1041_v60 = vmul.f32 %v2297_v18, %v1038_v59  ;;  %1823 = vmatprep.subr.mxu1 %v1042_v58  ;;  %v1030_v18 = vld [vmem:[%s2588_s6 + $0x8] sm:$0xff] }
 0x61e   : > { %1824 = vmatpush3.msra.mxu1 %v1042_v58  ;;  %v1034_v61 = vpop.permute.xlu1 %1033 }
 0x61f   : > { %1825 = vmatprep.subr.mxu1 %v1041_v60  ;;  %v1036_v63 = vmul.f32 %v2303_v21, %v1034_v61 }
 0x620   : > { %1826 = vmatpush3.msra.mxu1 %v1041_v60  ;;  %v1032_v62 = vpop.permute.xlu0 %1031 }
 0x621   : > { %1827 = vmatprep.subr.mxu1 %v1028_v50  ;;  %v1035_v0 = vmul.f32 %v2303_v21, %v1032_v62 }
 0x622   : > { %1828 = vmatpush3.msra.mxu1 %v1028_v50 }
 0x623   : > { %1829 = vmatprep.subr.mxu1 %v1027_v54 }
 0x624   : > { %1830 = vmatpush3.msra.mxu1 %v1027_v54 }
 0x625   : > { %1831 = vmatprep.subr.mxu1 %v1036_v63 }
 0x626   : > { %1832 = vmatpush3.msra.mxu1 %v1036_v63 }
 0x627   : > { %1833 = vmatprep.subr.mxu1 %v1035_v0 }
 0x628   : > { %1834 = vmatpush3.msra.mxu1 %v1035_v0 }
 0x629   : > { %1836 = vmatmul.mubr.msk.f32.vlgmr.msra.gmra.mxu1 %vm1055_vm2, %v1030_v18 }
 0x62a   : > { %1877 = vmatprep.mubr.msk.f32.mxu1 %vm723_vm1, %v2342_v36 }
 0x62b   : > { %v1048_v3 = vpop.permute.xlu1 %1047 }
 0x62d   : > { %v1053_v7 = vpop.permute.xlu0 %1052 }
 0x6e9   : > { %v1837_v1 = vpop.f32.mrf.mxu1 }
 0x6ea   : > { %v1134_v20 = vadd.f32 %v1837_v1, %v1053_v7 }
 0x6eb   : > { %v1128_v6 = vpop.f32.mrf.mxu1 }
 0x6ec   : > { %v1129_v19 = vadd.f32 %v1128_v6, %v1048_v3 }
 0x6ee   : > { %1870 = vmatprep.mubr.f32.mxu0 %v1129_v19 }
 0x6ef   : > { %1871 = vmatmul.mubr.f32.vlgmr.msra.gmra.mxu0 %v1134_v20 }
 0x6f0   : > { %1919 = vmatprep.mubr.msk.f32.mxu0 %vm723_vm1, %v2342_v36  ;;  %v1137_v36 = vld [vmem:[%s2590_s8] sm:$0xff] }
 0x7af   : > { %v1872_v21 = vpop.f32.mrf.mxu0 }
 0x7b0   : > { %1873 = vmatprep.subr.mxu1 %v1872_v21 }
 0x7b1   : > { %v1207_v22 = vpop.f32.mrf.mxu0  ;;  %1874 = vmatpush3.msra.mxu1 %v1872_v21 }
 0x7b2   : > { %1875 = vmatprep.subr.mxu1 %v1207_v22 }
 0x7b3   : > { %1876 = vmatpush3.msra.mxu1 %v1207_v22 }
 0x7b4   : > { %1878 = vmatmul.mubr.msk.f32.vlgmr.msra.gmra.mxu1 %vm723_vm1, %v2351_v39  ;;  %1880 = vmatprep.subr.mxu1 %v2197_v2 }
 0x7b5   : > { %1881 = vmatpush3.msra.mxu1 %v2197_v2 }
 0x7b6   : > { %1882 = vmatprep.subr.mxu1 %v2203_v4 }
 0x7b7   : > { %1883 = vmatpush3.msra.mxu1 %v2203_v4 }
 0x7b8   : > { %1884 = vmatprep.subr.mxu1 %v2210_v5 }
 0x7b9   : > { %1885 = vmatpush3.msra.mxu1 %v2210_v5 }
 0x7ba   : > { %1886 = vmatprep.subr.mxu1 %v2223_v8 }
 0x7bb   : > { %1887 = vmatpush3.msra.mxu1 %v2223_v8 }
 0x7bc   : > { %1888 = vmatprep.subr.mxu1 %v2231_v9 }
 0x7bd   : > { %1889 = vmatpush3.msra.mxu1 %v2231_v9 }
 0x7be   : > { %1890 = vmatprep.subr.mxu1 %v2238_v10 }
 0x7bf   : > { %1891 = vmatpush3.msra.mxu1 %v2238_v10 }
 0x7c0   : > { %1892 = vmatprep.subr.mxu1 %v2246_v11 }
 0x7c1   : > { %1893 = vmatpush3.msra.mxu1 %v2246_v11 }
 0x7c2   : > { %1894 = vmatprep.subr.mxu1 %v2253_v12 }
 0x7c3   : > { %1895 = vmatpush3.msra.mxu1 %v2253_v12 }
 0x7c4   : > { %1896 = vmatprep.subr.mxu1 %v2260_v13 }
 0x7c5   : > { %1897 = vmatpush3.msra.mxu1 %v2260_v13 }
 0x7c6   : > { %1898 = vmatprep.subr.mxu1 %v2267_v14 }
 0x7c7   : > { %1899 = vmatpush3.msra.mxu1 %v2267_v14 }
 0x7c8   : > { %1900 = vmatprep.subr.mxu1 %v2274_v15 }
 0x7c9   : > { %1901 = vmatpush3.msra.mxu1 %v2274_v15 }
 0x7ca   : > { %1902 = vmatprep.subr.mxu1 %v2281_v16 }
 0x7cb   : > { %1903 = vmatpush3.msra.mxu1 %v2281_v16 }
 0x7cc   : > { %1904 = vmatprep.subr.mxu1 %v2288_v17 }
 0x7cd   : > { %1905 = vmatpush3.msra.mxu1 %v2288_v17 }
 0x7ce   : > { %1906 = vmatprep.subr.mxu1 %v2313_v25 }
 0x7cf   : > { %1907 = vmatpush3.msra.mxu1 %v2313_v25 }
 0x7d0   : > { %1908 = vmatprep.subr.mxu1 %v2320_v26 }
 0x7d1   : > { %1909 = vmatpush3.msra.mxu1 %v2320_v26  ;;  %v1138_v26 = vld [vmem:[%s2590_s8 + $0x8] sm:$0xff] }
 0x7d2   : > { %1910 = vmatprep.subr.mxu1 %v2327_v27 }
 0x7d3   : > { %1911 = vmatpush3.msra.mxu1 %v2327_v27 }
 0x874   : > { %v1879_v2 = vpop.f32.mrf.mxu1 }
 0x875   : > { %1298 = vperm.xlu0 %1967, %v1879_v2  }
 0x876   : > { %v1282_v4 = vpop.f32.mrf.mxu1 }
 0x877   : > { %1293 = vperm.xlu1 %1966, %v1282_v4  }
 0x8f0   : > { %v1299_v5 = vpop.permute.xlu0 %1298 }
 0x8f1   : > { %v1302_v8 = vsub.f32 %v1134_v20, %v1299_v5 }
 0x8f2   : > { %v1294_v9 = vpop.permute.xlu1 %1293 }
 0x8f3   : > { %v1301_v10 = vsub.f32 %v1129_v19, %v1294_v9  ;;  %v1304_v12 = vmul.f32 %v1302_v8, %v1302_v8 }
 0x8f5   : > { %v1303_v11 = vmul.f32 %v1301_v10, %v1301_v10 }
 0x8f7   : > { %1912 = vmatprep.mubr.f32.mxu1 %v1303_v11 }
 0x8f8   : > { %1913 = vmatmul.mubr.f32.vlgmr.msra.gmra.mxu1 %v1304_v12 }
 0x9b8   : > { %v1914_v13 = vpop.f32.mrf.mxu1 }
 0x9b9   : > { %1915 = vmatprep.subr.mxu0 %v1914_v13 }
 0x9ba   : > { %v1371_v14 = vpop.f32.mrf.mxu1  ;;  %1916 = vmatpush3.msra.mxu0 %v1914_v13 }
 0x9bb   : > { %1917 = vmatprep.subr.mxu0 %v1371_v14 }
 0x9bc   : > { %1918 = vmatpush3.msra.mxu0 %v1371_v14 }
 0x9bd   : > { %1920 = vmatmul.mubr.msk.f32.vlgmr.msra.gmra.mxu0 %vm723_vm1, %v2351_v39  ;;  %v1140_v39 = vld [vmem:[%s2591_s9 + $0x8] sm:$0xff] }
 0xa7d   : > { %v1921_v15 = vpop.f32.mrf.mxu0 }
 0xa7e   : > { %v1452_v16 = vadd.f32 1e-05, %v1921_v15 }
 0xa7f   : > { %v1446_v17 = vpop.f32.mrf.mxu0 }
 0xa80   : > { %1980 = vrsqrt.f32 %v1452_v16  ;;  %v1447_v25 = vadd.f32 1e-05, %v1446_v17 }
 0xa82   : > { %1982 = vrsqrt.f32 %v1447_v25 }
 0xa8d   : > { %v1981_v27 = vpop.eup %1980 }
 0xa8e   : > { %v1458_v23 = vmul.f32 %v1981_v27, %v1138_v26 }
 0xa8f   : > { %v1983_v24 = vpop.eup %1982 }
 0xa90   : > { %1466 = vperm.xlu0 %1967, %v1458_v23   ;;  %v1457_v28 = vmul.f32 %v1983_v24, %v1137_v36 }
 0xa92   : > { %1461 = vperm.xlu1 %1966, %v1457_v28  }
 0xa94   : > { %1478 = vperm.xlu0 %1967, %v1140_v39  }
 0xa96   : > { %1473 = vperm.xlu1 %1966, %v1139_v29  }
 0xa98   : > { %525 = vperm.xlu0 %1967, %v507_v30  }
 0xa9a   : > { %520 = vperm.xlu1 %1966, %v506_v31  }
 0xb0b   : > { %v1467_v32 = vpop.permute.xlu0 %1466 }
 0xb0c   : > { %v1470_v34 = vmul.f32 %v1467_v32, %v1302_v8 }
 0xb0d   : > { %v1462_v33 = vpop.permute.xlu1 %1461 }
 0xb0e   : > { %v1469_v37 = vmul.f32 %v1462_v33, %v1301_v10 }
 0xb0f   : > { %v1479_v35 = vpop.permute.xlu0 %1478 }
 0xb10   : > { %v1482_v38 = vadd.f32 %v1479_v35, %v1470_v34 }
 0xb11   : > { %v1474_v42 = vpop.permute.xlu1 %1473 }
 0xb12   : > { %v1484_v43 = vmin.f32 %v1482_v38, 30.0  ;;  %v1481_v44 = vadd.f32 %v1474_v42, %v1469_v37 }
 0xb13   : > { %v526_v56 = vpop.permute.xlu0 %525 }
 0xb14   : > { %v1487_v45 = vmul.f32 1.442695, %v1484_v43  ;;  %v1483_v46 = vmin.f32 %v1481_v44, 30.0  ;;  %v623_v62 = vadd.f32 %v2388_v40, %v526_v56 }
 0xb15   : > { %v521_v59 = vpop.permute.xlu1 %520 }
 0xb16   : > { %1984 = vpow2.f32 %v1487_v45  ;;  %v1485_v47 = vmul.f32 1.442695, %v1483_v46  ;;  %v618_v1 = vadd.f32 %v2390_v41, %v521_v59 }
 0xb18   : > { %1986 = vpow2.f32 %v1485_v47 }
 0xb23   : > { %v1985_v48 = vpop.eup %1984 }
 0xb24   : > { %v1490_v49 = vadd.f32 2.0, %v1985_v48 }
 0xb25   : > { %v1987_v50 = vpop.eup %1986 }
 0xb26   : > { %v1492_v51 = vmul.f32 %v1985_v48, %v1490_v49  ;;  %v1489_v52 = vadd.f32 2.0, %v1987_v50 }
 0xb28   : > { %v1496_v53 = vadd.f32 2.0, %v1492_v51  ;;  %v1491_v54 = vmul.f32 %v1987_v50, %v1489_v52  ;;  %v1494_v57 = vmul.f32 %v1492_v51, %v1482_v38 }
 0xb2a   : > { %1988 = vrcp.f32 %v1496_v53  ;;  %v1495_v55 = vadd.f32 2.0, %v1491_v54  ;;  %v1493_v60 = vmul.f32 %v1491_v54, %v1481_v44 }
 0xb2c   : > { %1990 = vrcp.f32 %v1495_v55 }
 0xb37   : > { %v1989_v58 = vpop.eup %1988 }
 0xb38   : > { %v1500_v61 = vmul.f32 %v1989_v58, %v1494_v57 }
 0xb39   : > { %v1991_v63 = vpop.eup %1990 }
 0xb3a   : > { %v1502_v0 = vadd.f32 %v1500_v61, %v623_v62  ;;  %v1499_v18 = vmul.f32 %v1991_v63, %v1493_v60 }
 0xb3c   : > { %1504 = vst [vmem:[%s473_s28 + $0x8] sm:$0xff] %v1502_v0  ;;  %v1501_v40 = vadd.f32 %v1499_v18, %v618_v1 }
 0xb3e   : > { %1503 = vst [vmem:[%s473_s28] sm:$0xff] %v1501_v40 }
 0xb3f   : > { %2005 = shalt.err (!%p2002_p3)
}
 0xb40   : > { %s2006_s26 = scalar_lea.hbm %s2540_s17, 256  ;;  %s2010_s21 = scalar_lea.hbm %s2596_s14, 512 }
 0xb41   : > { %p2007_p4 = scmp.ne.s32.totalorder %s2540_s17, %s2006_s26  ;;  %p2011_p9 = scmp.lt.s32.totalorder %s2540_s17, %s2596_s14 }
 0xb42   : > { %p2012_p10 = scmp.lt.s32.totalorder %s2010_s21, %s2006_s26 }
 0xb43   : > { %p2008_p7 = pnand %p2007_p4, %p2173_p5 }
 0xb44   : > { %p2013_p11 = por %p2012_p10, %p2011_p9 }
 0xb45   : > { %p2009_p8 = pneg %p2008_p7 }
 0xb47   : > { %p2014_p12 = pnand %p2013_p11, %p2009_p8 }
 0xb49   : > { %2017 = shalt.err (!%p2014_p12)
}
 0xb4a   : > { %s2058_s12 = smov 128   ;;  %s2059_s24 = smov 8  }
 0xb4b   : > { %1922 = dma.vmem_to_hbm [thread:$0]  (%p2173_p5), %s2535_s15, 256, %s2540_s17, %s2542_s19, %s2058_s12, %s2058_s12, %s2059_s24  }
 0xb4c PF: > { %p1928_p13 = scmp.ge.s32.totalorder %s2052_s16, 2  ;;  %s1534_s27 = sand.u32 1, %s2040_s29  }
 0xb4d   : > { %s1535_s26 = scalar_lea.sflag [#allocation3], %s1534_s27 }
 0xb4e   : > { %p1925_p0 = pnand %p1928_p13, %p2177_p6 }
 0xb50   : > { %p1926_p1 = pneg %p1925_p0 }
 0xb52   : > { %2035 = dma.done.wait (%p1926_p1), %s1535_s26, 256  }
 0xb53   : > { %2037 = vsyncadd (%p1926_p1), %s1535_s26, 4294967040  ;;  %s2611_s16 = sld [smem:[#allocation6_spill]]  ;;  %s2614_s29 = smov %s2044_s30 }
 0xb54   : > { %s2612_s28 = sld [smem:[#allocation5_spill]] }
 0xb55   : > { %s2613_s15 = sld [smem:[#allocation7_spill]] }
 0xb59   : > { %p24_p2 = scmp.ge.s32.totalorder %s2611_s16, 4  }
 0xb5a   : > { %s2615_s30 = smov %s2612_s28 }
 0xb5b   :  { %26 = sbr.rel (!%p24_p2) target bundleno = 3 (0x3), region = 114 }
 0xb60   :  { %1540 = vsyncpa [#allocation3], 1 }
 0xb61   :  { %1542 = vsyncpa [#allocation3 + $0x1], 1 }

</bundles_post_ra>
